<compile_context>
chip_gen: v6e
topology: v6e:2x2x1
jax: 0.10.0
libtpu: 0.0.40
codegen_flags: <defaults>
</compile_context>

<pallas_src>
import functools

import jax
import jax.numpy as jnp
from jax.experimental import pallas as pl
from jax.experimental.pallas import tpu as pltpu

_BATCH_ALIGN = 16          # sublane alignment that also covers bf16 packing
_VMEM_TILE_BUDGET = 12 << 20   # double-buffered x/out tiles stay under this


def _round_up(v, m):
    return (v + m - 1) // m * m


def _tpu_generation():
    """Best-effort TPU generation tag ('v4'..'v7') from device_kind, else None."""
    try:
        kind = jax.devices()[0].device_kind.lower()
    except Exception:
        return None
    if "v7" in kind or "7x" in kind:
        return "v7"
    for tag in ("v6", "v5", "v4", "v3", "v2"):
        if tag in kind:
            return tag
    return None


def resolve_act_dtype(act_dtype=None):
    """bf16 transcendentals on v6e/v7x (bf16 EUP), f32 elsewhere."""
    if act_dtype is not None:
        return jnp.dtype(act_dtype)
    return jnp.dtype(jnp.bfloat16) if _tpu_generation() in ("v6", "v7") \
        else jnp.dtype(jnp.float32)


def _make_kernel(act_dtype):
    act_dtype = jnp.dtype(act_dtype)

    def kernel(x_ref,
               w1_ref, b1_ref, w2_ref, b2_ref, w3_ref, b3_ref,   # encoder
               w4_ref, b4_ref, w5_ref, b5_ref, w6_ref, b6_ref,   # decoder
               enc_ref, dec_ref):
        def pre_act(h, w_ref, b_ref):
            # Cast activation to the weight dtype right before the dot so the
            # MXU runs at bf16 rate; accumulate in f32; bias add in f32.
            return (jnp.dot(h.astype(w_ref.dtype), w_ref[...],
                            preferred_element_type=jnp.float32)
                    + b_ref[...])

        x = x_ref[...]                                            # f32 from HBM
        # ----- Encoder: Linear -> Tanh -> Linear -> Tanh -> Linear -----
        h = jnp.tanh(pre_act(x, w1_ref, b1_ref).astype(act_dtype))
        h = jnp.tanh(pre_act(h, w2_ref, b2_ref).astype(act_dtype))
        encoded = pre_act(h, w3_ref, b3_ref)                      # f32 (an output)
        # ----- Decoder: Linear -> Tanh -> Linear -> Tanh -> Linear -> Sigmoid -----
        d = jnp.tanh(pre_act(encoded, w4_ref, b4_ref).astype(act_dtype))
        d = jnp.tanh(pre_act(d, w5_ref, b5_ref).astype(act_dtype))
        decoded = jax.nn.sigmoid(pre_act(d, w6_ref, b6_ref).astype(act_dtype))

        enc_ref[...] = encoded.astype(enc_ref.dtype)
        dec_ref[...] = decoded.astype(dec_ref.dtype)

    return kernel


def prepare_params(params, matmul_dtype=jnp.bfloat16):
    """One-time conversion of PyTorch-style params ((out,in) weights, (out,) biases)
    into kernel layout: (in,out) weights in `matmul_dtype`, (1,out) f32 biases."""
    order = [("enc_w1", "enc_b1"), ("enc_w2", "enc_b2"), ("enc_w3", "enc_b3"),
             ("dec_w1", "dec_b1"), ("dec_w2", "dec_b2"), ("dec_w3", "dec_b3")]
    prepared = []
    for wname, bname in order:
        prepared.append(jnp.asarray(params[wname]).T.astype(matmul_dtype))
        prepared.append(jnp.asarray(params[bname])[None, :].astype(jnp.float32))
    return tuple(prepared)


def autoencoder_forward(x, prepared, *, batch_tile=4096, act_dtype=None,
                        out_dtype=jnp.bfloat16):
    """Fused forward pass. x: [B, input_dim]. prepared: output of prepare_params().
    Returns (encoded [B, hidden3], decoded [B, input_dim]) in `out_dtype`."""
    w1, b1, w2, b2, w3, b3, w4, b4, w5, b5, w6, b6 = prepared
    B, input_dim = x.shape
    hidden3 = w3.shape[1]
    assert w1.shape[0] == input_dim and w6.shape[1] == input_dim

    act_dtype = resolve_act_dtype(act_dtype)
    out_dtype = jnp.dtype(out_dtype)
    gen = _tpu_generation()

    # --- pick the batch tile (only tiled axis) ---
    out_bytes_row = (hidden3 + input_dim) * out_dtype.itemsize
    bytes_per_row = input_dim * x.dtype.itemsize + out_bytes_row
    max_tb = max(_BATCH_ALIGN,
                 (_VMEM_TILE_BUDGET // (2 * bytes_per_row))
                 // _BATCH_ALIGN * _BATCH_ALIGN)
    tb = min(int(batch_tile), B, max_tb)
    if tb < B:
        tb = _round_up(tb, _BATCH_ALIGN)
    if tb >= B:
        tb = B
        # v7x has two TensorCores: split so both get work (pointless on v5e/v6e).
        if gen == "v7" and B >= 2 * _BATCH_ALIGN:
            tb = _round_up((B + 1) // 2, _BATCH_ALIGN)
    grid = (pl.cdiv(B, tb),)

    def full_block(arr):
        # Full-extent block, constant index_map -> resident in VMEM across grid.
        return pl.BlockSpec(arr.shape, lambda i: (0,) * arr.ndim)

    in_specs = [pl.BlockSpec((tb, input_dim), lambda i: (i, 0))]
    for p in (w1, b1, w2, b2, w3, b3, w4, b4, w5, b5, w6, b6):
        in_specs.append(full_block(p))

    out_specs = [pl.BlockSpec((tb, hidden3), lambda i: (i, 0)),
                 pl.BlockSpec((tb, input_dim), lambda i: (i, 0))]
    out_shape = (jax.ShapeDtypeStruct((B, hidden3), out_dtype),
                 jax.ShapeDtypeStruct((B, input_dim), out_dtype))

    # Advisory cost estimate (matmuls are tiny; kernel is HBM-bound).
    weights = (w1, w2, w3, w4, w5, w6)
    flops = 2 * B * sum(int(w.shape[0]) * int(w.shape[1]) for w in weights)
    transcendentals = B * sum(int(w.shape[1]) for w in (w1, w2, w4, w5, w6))
    param_bytes = sum(int(p.size) * p.dtype.itemsize for p in prepared)
    bytes_accessed = (int(x.size) * x.dtype.itemsize + param_bytes
                      + B * out_bytes_row)

    encoded, decoded = pl.pallas_call(
        _make_kernel(act_dtype),
        out_shape=out_shape,
        grid_spec=pltpu.PrefetchScalarGridSpec(
            num_scalar_prefetch=0, grid=grid,
            in_specs=in_specs, out_specs=out_specs),
        compiler_params=pltpu.CompilerParams(
            dimension_semantics=("parallel",)),
        cost_estimate=pl.CostEstimate(flops=flops,
                                      transcendentals=transcendentals,
                                      bytes_accessed=bytes_accessed),
    )(x, w1, b1, w2, b2, w3, b3, w4, b4, w5, b5, w6, b6)
    return encoded, decoded


def init_params(key, input_dim, hidden1, hidden2, hidden3):
    """Deterministic PyTorch-style (out,in) weight init (uniform, Linear default)."""
    dims = [
        ("enc_w1", "enc_b1", input_dim, hidden1),
        ("enc_w2", "enc_b2", hidden1, hidden2),
        ("enc_w3", "enc_b3", hidden2, hidden3),
        ("dec_w1", "dec_b1", hidden3, hidden2),
        ("dec_w2", "dec_b2", hidden2, hidden1),
        ("dec_w3", "dec_b3", hidden1, input_dim),
    ]
    params = {}
    for wname, bname, fan_in, fan_out in dims:
        key, kw, kb = jax.random.split(key, 3)
        bound = 1.0 / jnp.sqrt(fan_in)
        params[wname] = jax.random.uniform(
            kw, (fan_out, fan_in), jnp.float32, -bound, bound)
        params[bname] = jax.random.uniform(
            kb, (fan_out,), jnp.float32, -bound, bound)
    return params


def _reference(x, params):
    """Pure-f32 PyTorch-equivalent reference."""
    def lin(h, w, b):
        return h @ w.T + b
    h = jnp.tanh(lin(x, params["enc_w1"], params["enc_b1"]))
    h = jnp.tanh(lin(h, params["enc_w2"], params["enc_b2"]))
    enc = lin(h, params["enc_w3"], params["enc_b3"])
    d = jnp.tanh(lin(enc, params["dec_w1"], params["dec_b1"]))
    d = jnp.tanh(lin(d, params["dec_w2"], params["dec_b2"]))
    dec = jax.nn.sigmoid(lin(d, params["dec_w3"], params["dec_b3"]))
    return enc, dec


def _reference_matched(x, prepared, act_dtype):
    """Reference that mirrors the kernel's mixed precision exactly."""
    w1, b1, w2, b2, w3, b3, w4, b4, w5, b5, w6, b6 = prepared

    def pre_act(h, w, b):
        return jnp.dot(h.astype(w.dtype), w,
                       preferred_element_type=jnp.float32) + b

    h = jnp.tanh(pre_act(x, w1, b1).astype(act_dtype))
    h = jnp.tanh(pre_act(h, w2, b2).astype(act_dtype))
    enc = pre_act(h, w3, b3)
    d = jnp.tanh(pre_act(enc, w4, b4).astype(act_dtype))
    d = jnp.tanh(pre_act(d, w5, b5).astype(act_dtype))
    dec = jax.nn.sigmoid(pre_act(d, w6, b6).astype(act_dtype))
    return enc, dec


def _f32(a):
    return jnp.asarray(a, jnp.float32)


if __name__ == "__main__":
    input_dim, hidden1, hidden2, hidden3 = 64, 32, 16, 8
    batch = 256

    key = jax.random.PRNGKey(0)
    key, kx = jax.random.split(key)
    x = jax.random.uniform(kx, (batch, input_dim), jnp.float32)
    params = init_params(key, input_dim, hidden1, hidden2, hidden3)

    enc_f32_ref, dec_f32_ref = _reference(x, params)

    # --- (1) f32 matmul/act/out path, >1 grid step: exact check vs reference ---
    prepared_f32 = prepare_params(params, matmul_dtype=jnp.float32)
    enc32, dec32 = autoencoder_forward(x, prepared_f32, batch_tile=128,
                                       act_dtype=jnp.float32,
                                       out_dtype=jnp.float32)
    jax.block_until_ready((enc32, dec32))
    assert enc32.shape == (batch, hidden3) and dec32.shape == (batch, input_dim)
    assert jnp.allclose(enc32, enc_f32_ref, atol=1e-4, rtol=1e-4), "f32 encoded mismatch"
    assert jnp.allclose(dec32, dec_f32_ref, atol=1e-4, rtol=1e-4), "f32 decoded mismatch"

    # --- (2) ragged batch (last grid block padded): B=200 with tile 96 ---
    xr = x[:200]
    encr, decr = autoencoder_forward(xr, prepared_f32, batch_tile=96,
                                     act_dtype=jnp.float32,
                                     out_dtype=jnp.float32)
    jax.block_until_ready((encr, decr))
    enc_r_ref, dec_r_ref = _reference(xr, params)
    assert encr.shape == (200, hidden3) and decr.shape == (200, input_dim)
    assert jnp.allclose(encr, enc_r_ref, atol=1e-4, rtol=1e-4), "ragged encoded mismatch"
    assert jnp.allclose(decr, dec_r_ref, atol=1e-4, rtol=1e-4), "ragged decoded mismatch"

    # --- (3) default fast path: bf16 MXU operands, auto act dtype, bf16 outputs ---
    prepared_bf16 = prepare_params(params, matmul_dtype=jnp.bfloat16)
    act = resolve_act_dtype(None)
    enc16, dec16 = autoencoder_forward(x, prepared_bf16)
    jax.block_until_ready((enc16, dec16))
    assert enc16.shape == (batch, hidden3) and dec16.shape == (batch, input_dim)
    assert enc16.dtype == jnp.bfloat16 and dec16.dtype == jnp.bfloat16

    enc_m_ref, dec_m_ref = _reference_matched(x, prepared_bf16, act)
    assert jnp.allclose(_f32(enc16), _f32(enc_m_ref), atol=3e-2), \
        "bf16 encoded mismatch (matched ref)"
    assert jnp.allclose(_f32(dec16), _f32(dec_m_ref), atol=3e-2), \
        "bf16 decoded mismatch (matched ref)"
    assert jnp.allclose(_f32(enc16), enc_f32_ref, atol=8e-2), \
        "bf16 encoded drifted from f32 ref"
    assert jnp.allclose(_f32(dec16), dec_f32_ref, atol=8e-2), \
        "bf16 decoded drifted from f32 ref"

    print("KERNEL_OK")
</pallas_src>

<mosaic_0001>
module attributes {stable_mosaic.version = 11 : i64} {
  func.func @kernel(%arg0: i32, %arg1: memref<128x64xf32, #tpu.memory_space<vmem>>, %arg2: memref<64x32xf32, #tpu.memory_space<vmem>>, %arg3: memref<1x32xf32, #tpu.memory_space<vmem>>, %arg4: memref<32x16xf32, #tpu.memory_space<vmem>>, %arg5: memref<1x16xf32, #tpu.memory_space<vmem>>, %arg6: memref<16x8xf32, #tpu.memory_space<vmem>>, %arg7: memref<1x8xf32, #tpu.memory_space<vmem>>, %arg8: memref<8x16xf32, #tpu.memory_space<vmem>>, %arg9: memref<1x16xf32, #tpu.memory_space<vmem>>, %arg10: memref<16x32xf32, #tpu.memory_space<vmem>>, %arg11: memref<1x32xf32, #tpu.memory_space<vmem>>, %arg12: memref<32x64xf32, #tpu.memory_space<vmem>>, %arg13: memref<1x64xf32, #tpu.memory_space<vmem>>, %arg14: memref<128x8xf32, #tpu.memory_space<vmem>>, %arg15: memref<128x64xf32, #tpu.memory_space<vmem>>) attributes {dimension_semantics = [#tpu.dimension_semantics<parallel>], iteration_bounds = array<i64: 2>, scalar_prefetch = 0 : i64, scratch_operands = 0 : i64, tpu.core_type = #tpu.core_type<tc>, window_params = [{transform_indices = @transform_0, window_bounds = array<i64: 128, 64>}, {pipeline_mode = #tpu.pipeline_mode<synchronous>, transform_indices = @transform_1, window_bounds = array<i64: 64, 32>}, {pipeline_mode = #tpu.pipeline_mode<synchronous>, transform_indices = @transform_2, window_bounds = array<i64: 1, 32>}, {pipeline_mode = #tpu.pipeline_mode<synchronous>, transform_indices = @transform_3, window_bounds = array<i64: 32, 16>}, {pipeline_mode = #tpu.pipeline_mode<synchronous>, transform_indices = @transform_4, window_bounds = array<i64: 1, 16>}, {pipeline_mode = #tpu.pipeline_mode<synchronous>, transform_indices = @transform_5, window_bounds = array<i64: 16, 8>}, {pipeline_mode = #tpu.pipeline_mode<synchronous>, transform_indices = @transform_6, window_bounds = array<i64: 1, 8>}, {pipeline_mode = #tpu.pipeline_mode<synchronous>, transform_indices = @transform_7, window_bounds = array<i64: 8, 16>}, {pipeline_mode = #tpu.pipeline_mode<synchronous>, transform_indices = @transform_8, window_bounds = array<i64: 1, 16>}, {pipeline_mode = #tpu.pipeline_mode<synchronous>, transform_indices = @transform_9, window_bounds = array<i64: 16, 32>}, {pipeline_mode = #tpu.pipeline_mode<synchronous>, transform_indices = @transform_10, window_bounds = array<i64: 1, 32>}, {pipeline_mode = #tpu.pipeline_mode<synchronous>, transform_indices = @transform_11, window_bounds = array<i64: 32, 64>}, {pipeline_mode = #tpu.pipeline_mode<synchronous>, transform_indices = @transform_12, window_bounds = array<i64: 1, 64>}, {transform_indices = @transform_13, window_bounds = array<i64: 128, 8>}, {transform_indices = @transform_14, window_bounds = array<i64: 128, 64>}]} {
    %c0 = arith.constant 0 : index
    %c0_0 = arith.constant 0 : index
    %0 = vector.load %arg1[%c0, %c0_0] : memref<128x64xf32, #tpu.memory_space<vmem>>, vector<128x64xf32>
    %c0_1 = arith.constant 0 : index
    %c0_2 = arith.constant 0 : index
    %1 = vector.load %arg2[%c0_1, %c0_2] : memref<64x32xf32, #tpu.memory_space<vmem>>, vector<64x32xf32>
    %cst = arith.constant dense<0.000000e+00> : vector<128x32xf32>
    %2 = tpu.matmul %0, %1, %cst {dimension_numbers = #tpu.dot_dimension_numbers<[1], [0], [0], [1], [0, 0, 1, 1], [], []>} : vector<128x64xf32>, vector<64x32xf32>, vector<128x32xf32> -> vector<128x32xf32>
    %c0_3 = arith.constant 0 : index
    %c0_4 = arith.constant 0 : index
    %3 = vector.load %arg3[%c0_3, %c0_4] : memref<1x32xf32, #tpu.memory_space<vmem>>, vector<1x32xf32>
    %4 = vector.broadcast %3 : vector<1x32xf32> to vector<128x32xf32>
    %5 = arith.addf %2, %4 : vector<128x32xf32>
    %6 = math.tanh %5 : vector<128x32xf32>
    %c0_5 = arith.constant 0 : index
    %c0_6 = arith.constant 0 : index
    %7 = vector.load %arg4[%c0_5, %c0_6] : memref<32x16xf32, #tpu.memory_space<vmem>>, vector<32x16xf32>
    %cst_7 = arith.constant dense<0.000000e+00> : vector<128x16xf32>
    %8 = tpu.matmul %6, %7, %cst_7 {dimension_numbers = #tpu.dot_dimension_numbers<[1], [0], [0], [1], [0, 0, 1, 1], [], []>} : vector<128x32xf32>, vector<32x16xf32>, vector<128x16xf32> -> vector<128x16xf32>
    %c0_8 = arith.constant 0 : index
    %c0_9 = arith.constant 0 : index
    %9 = vector.load %arg5[%c0_8, %c0_9] : memref<1x16xf32, #tpu.memory_space<vmem>>, vector<1x16xf32>
    %10 = vector.broadcast %9 : vector<1x16xf32> to vector<128x16xf32>
    %11 = arith.addf %8, %10 : vector<128x16xf32>
    %12 = math.tanh %11 : vector<128x16xf32>
    %c0_10 = arith.constant 0 : index
    %c0_11 = arith.constant 0 : index
    %13 = vector.load %arg6[%c0_10, %c0_11] : memref<16x8xf32, #tpu.memory_space<vmem>>, vector<16x8xf32>
    %cst_12 = arith.constant dense<0.000000e+00> : vector<128x8xf32>
    %14 = tpu.matmul %12, %13, %cst_12 {dimension_numbers = #tpu.dot_dimension_numbers<[1], [0], [0], [1], [0, 0, 1, 1], [], []>} : vector<128x16xf32>, vector<16x8xf32>, vector<128x8xf32> -> vector<128x8xf32>
    %c0_13 = arith.constant 0 : index
    %c0_14 = arith.constant 0 : index
    %15 = vector.load %arg7[%c0_13, %c0_14] : memref<1x8xf32, #tpu.memory_space<vmem>>, vector<1x8xf32>
    %16 = vector.broadcast %15 : vector<1x8xf32> to vector<128x8xf32>
    %17 = arith.addf %14, %16 : vector<128x8xf32>
    %c0_15 = arith.constant 0 : index
    %c0_16 = arith.constant 0 : index
    %18 = vector.load %arg8[%c0_15, %c0_16] : memref<8x16xf32, #tpu.memory_space<vmem>>, vector<8x16xf32>
    %cst_17 = arith.constant dense<0.000000e+00> : vector<128x16xf32>
    %19 = tpu.matmul %17, %18, %cst_17 {dimension_numbers = #tpu.dot_dimension_numbers<[1], [0], [0], [1], [0, 0, 1, 1], [], []>} : vector<128x8xf32>, vector<8x16xf32>, vector<128x16xf32> -> vector<128x16xf32>
    %c0_18 = arith.constant 0 : index
    %c0_19 = arith.constant 0 : index
    %20 = vector.load %arg9[%c0_18, %c0_19] : memref<1x16xf32, #tpu.memory_space<vmem>>, vector<1x16xf32>
    %21 = vector.broadcast %20 : vector<1x16xf32> to vector<128x16xf32>
    %22 = arith.addf %19, %21 : vector<128x16xf32>
    %23 = math.tanh %22 : vector<128x16xf32>
    %c0_20 = arith.constant 0 : index
    %c0_21 = arith.constant 0 : index
    %24 = vector.load %arg10[%c0_20, %c0_21] : memref<16x32xf32, #tpu.memory_space<vmem>>, vector<16x32xf32>
    %cst_22 = arith.constant dense<0.000000e+00> : vector<128x32xf32>
    %25 = tpu.matmul %23, %24, %cst_22 {dimension_numbers = #tpu.dot_dimension_numbers<[1], [0], [0], [1], [0, 0, 1, 1], [], []>} : vector<128x16xf32>, vector<16x32xf32>, vector<128x32xf32> -> vector<128x32xf32>
    %c0_23 = arith.constant 0 : index
    %c0_24 = arith.constant 0 : index
    %26 = vector.load %arg11[%c0_23, %c0_24] : memref<1x32xf32, #tpu.memory_space<vmem>>, vector<1x32xf32>
    %27 = vector.broadcast %26 : vector<1x32xf32> to vector<128x32xf32>
    %28 = arith.addf %25, %27 : vector<128x32xf32>
    %29 = math.tanh %28 : vector<128x32xf32>
    %c0_25 = arith.constant 0 : index
    %c0_26 = arith.constant 0 : index
    %30 = vector.load %arg12[%c0_25, %c0_26] : memref<32x64xf32, #tpu.memory_space<vmem>>, vector<32x64xf32>
    %cst_27 = arith.constant dense<0.000000e+00> : vector<128x64xf32>
    %31 = tpu.matmul %29, %30, %cst_27 {dimension_numbers = #tpu.dot_dimension_numbers<[1], [0], [0], [1], [0, 0, 1, 1], [], []>} : vector<128x32xf32>, vector<32x64xf32>, vector<128x64xf32> -> vector<128x64xf32>
    %c0_28 = arith.constant 0 : index
    %c0_29 = arith.constant 0 : index
    %32 = vector.load %arg13[%c0_28, %c0_29] : memref<1x64xf32, #tpu.memory_space<vmem>>, vector<1x64xf32>
    %33 = vector.broadcast %32 : vector<1x64xf32> to vector<128x64xf32>
    %34 = arith.addf %31, %33 : vector<128x64xf32>
    %35 = arith.negf %34 : vector<128x64xf32>
    %36 = math.exp %35 : vector<128x64xf32>
    %cst_30 = arith.constant 1.000000e+00 : f32
    %37 = vector.broadcast %cst_30 : f32 to vector<128x64xf32>
    %38 = arith.addf %37, %36 : vector<128x64xf32>
    %39 = arith.divf %37, %38 : vector<128x64xf32>
    %c0_31 = arith.constant 0 : index
    %c0_32 = arith.constant 0 : index
    %40 = vector.load %arg14[%c0_31, %c0_32] : memref<128x8xf32, #tpu.memory_space<vmem>>, vector<128x8xf32>
    tpu.vector_store %arg14[%c0_31, %c0_32], %17 {strides = array<i32>} : memref<128x8xf32, #tpu.memory_space<vmem>>, vector<128x8xf32>,
    %c0_33 = arith.constant 0 : index
    %c0_34 = arith.constant 0 : index
    %41 = vector.load %arg15[%c0_33, %c0_34] : memref<128x64xf32, #tpu.memory_space<vmem>>, vector<128x64xf32>
    tpu.vector_store %arg15[%c0_33, %c0_34], %39 {strides = array<i32>} : memref<128x64xf32, #tpu.memory_space<vmem>>, vector<128x64xf32>,
    return
  }
  func.func @transform_0(%arg0: i32) -> (i32, i32) {
    %c0_i32 = arith.constant 0 : i32
    %c0_i32_0 = arith.constant 0 : i32
    return %arg0, %c0_i32 : i32, i32
  }
  func.func @transform_1(%arg0: i32) -> (i32, i32) {
    %c0_i32 = arith.constant 0 : i32
    %c0_i32_0 = arith.constant 0 : i32
    %c0_i32_1 = arith.constant 0 : i32
    return %c0_i32, %c0_i32_0 : i32, i32
  }
  func.func @transform_2(%arg0: i32) -> (i32, i32) {
    %c0_i32 = arith.constant 0 : i32
    %c0_i32_0 = arith.constant 0 : i32
    %c0_i32_1 = arith.constant 0 : i32
    return %c0_i32, %c0_i32_0 : i32, i32
  }
  func.func @transform_3(%arg0: i32) -> (i32, i32) {
    %c0_i32 = arith.constant 0 : i32
    %c0_i32_0 = arith.constant 0 : i32
    %c0_i32_1 = arith.constant 0 : i32
    return %c0_i32, %c0_i32_0 : i32, i32
  }
  func.func @transform_4(%arg0: i32) -> (i32, i32) {
    %c0_i32 = arith.constant 0 : i32
    %c0_i32_0 = arith.constant 0 : i32
    %c0_i32_1 = arith.constant 0 : i32
    return %c0_i32, %c0_i32_0 : i32, i32
  }
  func.func @transform_5(%arg0: i32) -> (i32, i32) {
    %c0_i32 = arith.constant 0 : i32
    %c0_i32_0 = arith.constant 0 : i32
    %c0_i32_1 = arith.constant 0 : i32
    return %c0_i32, %c0_i32_0 : i32, i32
  }
  func.func @transform_6(%arg0: i32) -> (i32, i32) {
    %c0_i32 = arith.constant 0 : i32
    %c0_i32_0 = arith.constant 0 : i32
    %c0_i32_1 = arith.constant 0 : i32
    return %c0_i32, %c0_i32_0 : i32, i32
  }
  func.func @transform_7(%arg0: i32) -> (i32, i32) {
    %c0_i32 = arith.constant 0 : i32
    %c0_i32_0 = arith.constant 0 : i32
    %c0_i32_1 = arith.constant 0 : i32
    return %c0_i32, %c0_i32_0 : i32, i32
  }
  func.func @transform_8(%arg0: i32) -> (i32, i32) {
    %c0_i32 = arith.constant 0 : i32
    %c0_i32_0 = arith.constant 0 : i32
    %c0_i32_1 = arith.constant 0 : i32
    return %c0_i32, %c0_i32_0 : i32, i32
  }
  func.func @transform_9(%arg0: i32) -> (i32, i32) {
    %c0_i32 = arith.constant 0 : i32
    %c0_i32_0 = arith.constant 0 : i32
    %c0_i32_1 = arith.constant 0 : i32
    return %c0_i32, %c0_i32_0 : i32, i32
  }
  func.func @transform_10(%arg0: i32) -> (i32, i32) {
    %c0_i32 = arith.constant 0 : i32
    %c0_i32_0 = arith.constant 0 : i32
    %c0_i32_1 = arith.constant 0 : i32
    return %c0_i32, %c0_i32_0 : i32, i32
  }
  func.func @transform_11(%arg0: i32) -> (i32, i32) {
    %c0_i32 = arith.constant 0 : i32
    %c0_i32_0 = arith.constant 0 : i32
    %c0_i32_1 = arith.constant 0 : i32
    return %c0_i32, %c0_i32_0 : i32, i32
  }
  func.func @transform_12(%arg0: i32) -> (i32, i32) {
    %c0_i32 = arith.constant 0 : i32
    %c0_i32_0 = arith.constant 0 : i32
    %c0_i32_1 = arith.constant 0 : i32
    return %c0_i32, %c0_i32_0 : i32, i32
  }
  func.func @transform_13(%arg0: i32) -> (i32, i32) {
    %c0_i32 = arith.constant 0 : i32
    %c0_i32_0 = arith.constant 0 : i32
    return %arg0, %c0_i32 : i32, i32
  }
  func.func @transform_14(%arg0: i32) -> (i32, i32) {
    %c0_i32 = arith.constant 0 : i32
    %c0_i32_0 = arith.constant 0 : i32
    return %arg0, %c0_i32 : i32, i32
  }
}

</mosaic_0001>

<bundles_post_ra>
// kernel: tpu_custom_call.1
= control target key start
LH: loop header
LB: loop body
LE: loop exit
PB: predicated region body
PF: predicated region fallthrough
CT: control target
= control target key end

     0   :  { %s2727_s29 = smov 0   ;;  %s3051_s0 = inlined_call_operand.vmem [shape: f32[256,64], index: 0, kind: input, shape index: {}]   ;;  %s3052_s1 = inlined_call_operand.vmem [shape: f32[64,32], index: 1, kind: input, shape index: {}]   ;;  %s3053_s2 = inlined_call_operand.vmem [shape: f32[1,32], index: 2, kind: input, shape index: {}]   ;;  %s3054_s3 = inlined_call_operand.vmem [shape: f32[32,16], index: 3, kind: input, shape index: {}]   ;;  %s3055_s4 = inlined_call_operand.vmem [shape: f32[1,16], index: 4, kind: input, shape index: {}]   ;;  %s3056_s5 = inlined_call_operand.vmem [shape: f32[16,8], index: 5, kind: input, shape index: {}]   ;;  %s3057_s6 = inlined_call_operand.vmem [shape: f32[1,8], index: 6, kind: input, shape index: {}]   ;;  %s3058_s7 = inlined_call_operand.vmem [shape: f32[8,16], index: 7, kind: input, shape index: {}]   ;;  %s3059_s8 = inlined_call_operand.vmem [shape: f32[1,16], index: 8, kind: input, shape index: {}]   ;;  %s3060_s9 = inlined_call_operand.vmem [shape: f32[16,32], index: 9, kind: input, shape index: {}]   ;;  %s3061_s10 = inlined_call_operand.vmem [shape: f32[1,32], index: 10, kind: input, shape index: {}]   ;;  %s3062_s11 = inlined_call_operand.vmem [shape: f32[32,64], index: 11, kind: input, shape index: {}]   ;;  %s3063_s12 = inlined_call_operand.vmem [shape: f32[1,64], index: 12, kind: input, shape index: {}]   ;;  %s3064_s13 = inlined_call_operand.vmem [shape: f32[256,8], index: 13, kind: output, shape index: {0}]   ;;  %s3065_s14 = inlined_call_operand.vmem [shape: f32[256,64], index: 14, kind: output, shape index: {1}]  }
   0x1 LB: > { %s2008_s30 = sadd.s32 4294967295, %s2650_s29   ;;  %p2012_p0 = scmp.ge.s32.totalorder %s2650_s29, 1  ;;  %s2650_s29 = sphi %s2727_s29, %s25_s29  }
   0x2   : > { %p416_p1 = scmp.lt.s32.totalorder %s2650_s29, 3 }
   0x4   : > { %p417_p2 = pnand %p2012_p0, %p416_p1 }
   0x5   : > { %s2013_s19 = sshll.u32 (!%p417_p2), %s2008_s30, 4 }
   0x6   : > { %420 = sbr.rel (%p417_p2) target bundleno = 1333 (0x535), region = 72  ;;  %p468_p3 = scmp.lt.s32.totalorder (!%p417_p2), %s2013_s19, 31 }
   0xb   : > { %v508_v0 = vld [vmem:[%s3052_s1 + $0x38] sm:$0xff]  ;;  %v507_v1 = vld [vmem:[%s3052_s1 + $0x30] sm:$0xff]  ;;  %v506_v2 = vld [vmem:[%s3052_s1 + $0x28] sm:$0xff]  ;;  %s3067_s19 = smov (!%p468_p3, %s2013_s19), 31  ;;  %vm516_vm0 = vcmask 523264   ;;  %vm737_vm1 = vcmask 261120  }
   0xc   : > { %2256 = vmatprep.subr.mxu0 %v508_v0  ;;  %v505_v3 = vld [vmem:[%s3052_s1 + $0x20] sm:$0xff]  ;;  %s2747_s24 = sshll.u32 %s3067_s19, 3  ;;  %v504_v4 = vld [vmem:[%s3052_s1 + $0x18] sm:$0xff]  ;;  %v503_v6 = vld [vmem:[%s3052_s1 + $0x10] sm:$0xff]  ;;  %vm956_vm2 = vcmask 130048   ;;  %vm1158_vm3 = vcmask 64512  }
   0xd   : > { %2257 = vmatpush3.msra.mxu0 %v508_v0  ;;  %s2756_s30 = scalar_lea.vmem %s3051_s0, %s2747_s24  ;;  %v502_v7 = vld [vmem:[%s3052_s1 + $0x8] sm:$0xff]  ;;  %v501_v8 = vld [vmem:[%s3052_s1] sm:$0xff]  ;;  %v729_v24 = vld [vmem:[%s3054_s3 + $0x18] sm:$0xff]  ;;  %s2867_s15 = scalar_lea.vmem %s3064_s13, %s2747_s24 }
   0xe   : > { %2258 = vmatprep.subr.mxu0 %v507_v1  ;;  %v485_v5 = vld [vmem:[%s2756_s30] sm:$0xff]  ;;  %v486_v9 = vld [vmem:[%s2756_s30 + $0x8] sm:$0xff]  ;;  %v487_v10 = vld [vmem:[%s2756_s30 + $0x10] sm:$0xff]  ;;  %2296 = vmatprep.subr.mxu1 %v729_v24  ;;  %s3014_s22 = scalar_lea.vmem %s3065_s14, %s2747_s24 }
   0xf   : > { %2259 = vmatpush3.msra.mxu0 %v507_v1  ;;  %2272 = vmatprep.mubr.msk.f32.mxu0 %vm516_vm0, %v485_v5  ;;  %v488_v11 = vld [vmem:[%s2756_s30 + $0x18] sm:$0xff]  ;;  %v489_v12 = vld [vmem:[%s2756_s30 + $0x20] sm:$0xff]  ;;  %v490_v13 = vld [vmem:[%s2756_s30 + $0x28] sm:$0xff] }
  0x10   : > { %2260 = vmatprep.subr.mxu0 %v506_v2  ;;  %v491_v14 = vld [vmem:[%s2756_s30 + $0x30] sm:$0xff]  ;;  %v492_v15 = vld [vmem:[%s2756_s30 + $0x38] sm:$0xff]  ;;  %v493_v16 = vld [vmem:[%s2756_s30 + $0x40] sm:$0xff]  ;;  %2297 = vmatpush3.msra.mxu1 %v729_v24 }
  0x11   : > { %2261 = vmatpush3.msra.mxu0 %v506_v2  ;;  %v494_v17 = vld [vmem:[%s2756_s30 + $0x48] sm:$0xff]  ;;  %v495_v18 = vld [vmem:[%s2756_s30 + $0x50] sm:$0xff]  ;;  %v496_v19 = vld [vmem:[%s2756_s30 + $0x58] sm:$0xff] }
  0x12   : > { %2262 = vmatprep.subr.mxu0 %v505_v3  ;;  %v497_v20 = vld [vmem:[%s2756_s30 + $0x60] sm:$0xff]  ;;  %v498_v21 = vld [vmem:[%s2756_s30 + $0x68] sm:$0xff]  ;;  %v499_v22 = vld [vmem:[%s2756_s30 + $0x70] sm:$0xff] }
  0x13   : > { %2263 = vmatpush3.msra.mxu0 %v505_v3  ;;  %v500_v23 = vld [vmem:[%s2756_s30 + $0x78] sm:$0xff]  ;;  %v728_v25 = vld [vmem:[%s3054_s3 + $0x10] sm:$0xff]  ;;  %v727_v26 = vld [vmem:[%s3054_s3 + $0x8] sm:$0xff] }
  0x14   : > { %2264 = vmatprep.subr.mxu0 %v504_v4  ;;  %2298 = vmatprep.subr.mxu1 %v728_v25  ;;  %v726_v27 = vld [vmem:[%s3054_s3] sm:$0xff]  ;;  %v948_v28 = vld [vmem:[%s3056_s5 + $0x8] sm:$0xff] }
  0x15   : > { %2265 = vmatpush3.msra.mxu0 %v504_v4  ;;  %2299 = vmatpush3.msra.mxu1 %v728_v25  ;;  %v2019_v29 = vld [vmem:[%s3053_s2] ss:$0 sm:$0xff] }
  0x16   : > { %2266 = vmatprep.subr.mxu0 %v503_v6  ;;  %2300 = vmatprep.subr.mxu1 %v727_v26 }
  0x17   : > { %2267 = vmatpush3.msra.mxu0 %v503_v6  ;;  %2301 = vmatpush3.msra.mxu1 %v727_v26 }
  0x18   : > { %2268 = vmatprep.subr.mxu0 %v502_v7  ;;  %2302 = vmatprep.subr.mxu1 %v726_v27 }
  0x19   : > { %2269 = vmatpush3.msra.mxu0 %v502_v7  ;;  %2303 = vmatpush3.msra.mxu1 %v726_v27 }
  0x1a   : > { %2270 = vmatprep.subr.mxu0 %v501_v8  ;;  %2328 = vmatprep.subr.mxu1 %v948_v28 }
  0x1b   : > { %2271 = vmatpush3.msra.mxu0 %v501_v8 }
  0x1c   : > { %2273 = vmatmul.mubr.msk.f32.vlgmr.msra.gmra.mxu0 %vm516_vm0, %v486_v9 }
  0x1d   : > { %2275 = vmatprep.mubr.msk.f32.mxu0 %vm516_vm0, %v487_v10 }
  0x20   : > { %2276 = vmatmul.mubr.msk.f32.gmra.mxu0 %vm516_vm0, %v488_v11 }
  0x21   : > { %2278 = vmatprep.mubr.msk.f32.mxu0 %vm516_vm0, %v489_v12 }
  0x24   : > { %2279 = vmatmul.mubr.msk.f32.gmra.mxu0 %vm516_vm0, %v490_v13 }
  0x25   : > { %2281 = vmatprep.mubr.msk.f32.mxu0 %vm516_vm0, %v491_v14  ;;  %v947_v14 = vld [vmem:[%s3056_s5] sm:$0xff] }
  0x28   : > { %2282 = vmatmul.mubr.msk.f32.gmra.mxu0 %vm516_vm0, %v492_v15  ;;  %v1150_v15 = vld [vmem:[%s3058_s7] sm:$0xff] }
  0x29   : > { %2284 = vmatprep.mubr.msk.f32.mxu0 %vm516_vm0, %v493_v16  ;;  %2356 = vmatprep.subr.mxu0 %v1150_v15  ;;  %v2036_v16 = vld [vmem:[%s3055_s4] ss:$0 sm:$0xff] }
  0x2a   : > { %2357 = vmatpush3.msra.mxu0 %v1150_v15 }
  0x2c   : > { %2285 = vmatmul.mubr.msk.f32.gmra.mxu0 %vm516_vm0, %v494_v17 }
  0x2d   : > { %2287 = vmatprep.mubr.msk.f32.mxu0 %vm516_vm0, %v495_v18 }
  0x30   : > { %2288 = vmatmul.mubr.msk.f32.gmra.mxu0 %vm516_vm0, %v496_v19 }
  0x31   : > { %2290 = vmatprep.mubr.msk.f32.mxu0 %vm516_vm0, %v497_v20 }
  0x34   : > { %2291 = vmatmul.mubr.msk.f32.gmra.mxu0 %vm516_vm0, %v498_v21 }
  0x35   : > { %2293 = vmatprep.mubr.msk.f32.mxu0 %vm516_vm0, %v499_v22 }
  0x38   : > { %2294 = vmatmul.mubr.msk.f32.gmra.mxu0 %vm516_vm0, %v500_v23 }
  0xdc   : > { %v2274_v30 = vpop.f32.mrf.mxu0 }
  0xdd   : > { %v637_v31 = vadd.f32 %v2274_v30, %v2019_v29 }
  0xde   : > { %v631_v32 = vpop.f32.mrf.mxu0 }
  0xdf   : > { %v632_v33 = vadd.f32 %v2019_v29, %v631_v32 }
  0xe0   : > { %v2277_v34 = vpop.f32.mrf.mxu0 }
  0xe1   : > { %2452 = vtanh.f32 %v632_v33  ;;  %v647_v35 = vadd.f32 %v2277_v34, %v2019_v29 }
  0xe2   : > { %2454 = vtanh.f32 %v637_v31  ;;  %v641_v36 = vpop.f32.mrf.mxu0 }
  0xe3   : > { %v642_v37 = vadd.f32 %v2019_v29, %v641_v36 }
  0xe4   : > { %v2280_v38 = vpop.f32.mrf.mxu0 }
  0xe5   : > { %2456 = vtanh.f32 %v642_v37  ;;  %v657_v39 = vadd.f32 %v2280_v38, %v2019_v29 }
  0xe6   : > { %2458 = vtanh.f32 %v647_v35  ;;  %v651_v40 = vpop.f32.mrf.mxu0 }
  0xe7   : > { %v652_v41 = vadd.f32 %v2019_v29, %v651_v40 }
  0xe8   : > { %v2283_v42 = vpop.f32.mrf.mxu0 }
  0xe9   : > { %2460 = vtanh.f32 %v652_v41  ;;  %v667_v43 = vadd.f32 %v2283_v42, %v2019_v29 }
  0xea   : > { %2462 = vtanh.f32 %v657_v39  ;;  %v661_v44 = vpop.f32.mrf.mxu0 }
  0xeb   : > { %v662_v45 = vadd.f32 %v2019_v29, %v661_v44 }
  0xec   : > { %v2286_v46 = vpop.f32.mrf.mxu0 }
  0xed   : > { %2464 = vtanh.f32 %v662_v45  ;;  %v677_v48 = vadd.f32 %v2286_v46, %v2019_v29 }
  0xee   : > { %v2453_v47 = vpop.eup %2452  ;;  %2466 = vtanh.f32 %v667_v43  ;;  %v671_v49 = vpop.f32.mrf.mxu0 }
  0xef   : > { %v2455_v50 = vpop.eup %2454  ;;  %v672_v51 = vadd.f32 %v2019_v29, %v671_v49  ;;  %2304 = vmatprep.mubr.msk.f32.mxu1 %vm737_vm1, %v2453_v47 }
  0xf0   : > { %v2289_v52 = vpop.f32.mrf.mxu0  ;;  %2305 = vmatmul.mubr.msk.f32.vlgmr.msra.gmra.mxu1 %vm737_vm1, %v2455_v50 }
  0xf1   : > { %2468 = vtanh.f32 %v672_v51  ;;  %2329 = vmatpush3.msra.mxu1 %v948_v28  ;;  %v687_v54 = vadd.f32 %v2289_v52, %v2019_v29 }
  0xf2   : > { %v2457_v53 = vpop.eup %2456  ;;  %2470 = vtanh.f32 %v677_v48  ;;  %v681_v55 = vpop.f32.mrf.mxu0  ;;  %2330 = vmatprep.subr.mxu1 %v947_v14 }
  0xf3   : > { %v2459_v56 = vpop.eup %2458  ;;  %v682_v57 = vadd.f32 %v2019_v29, %v681_v55  ;;  %2307 = vmatprep.mubr.msk.f32.mxu1 %vm737_vm1, %v2457_v53  ;;  %2331 = vmatpush3.msra.mxu1 %v947_v14 }
  0xf4   : > { %v2292_v58 = vpop.f32.mrf.mxu0  ;;  %2308 = vmatmul.mubr.msk.f32.gmra.mxu1 %vm737_vm1, %v2459_v56  ;;  %2442 = vmatprep.subr.mxu1 %v1150_v15 }
  0xf5   : > { %2472 = vtanh.f32 %v682_v57  ;;  %v697_v60 = vadd.f32 %v2292_v58, %v2019_v29 }
  0xf6   : > { %v2461_v59 = vpop.eup %2460  ;;  %2474 = vtanh.f32 %v687_v54  ;;  %v691_v61 = vpop.f32.mrf.mxu0 }
  0xf7   : > { %v2463_v62 = vpop.eup %2462  ;;  %v692_v63 = vadd.f32 %v2019_v29, %v691_v61  ;;  %2310 = vmatprep.mubr.msk.f32.mxu1 %vm737_vm1, %v2461_v59 }
  0xf8   : > { %v2295_v0 = vpop.f32.mrf.mxu0  ;;  %2311 = vmatmul.mubr.msk.f32.gmra.mxu1 %vm737_vm1, %v2463_v62 }
  0xf9   : > { %2476 = vtanh.f32 %v692_v63  ;;  %v707_v2 = vadd.f32 %v2295_v0, %v2019_v29 }
  0xfa   : > { %v2465_v1 = vpop.eup %2464  ;;  %2478 = vtanh.f32 %v697_v60  ;;  %v701_v3 = vpop.f32.mrf.mxu0 }
  0xfb   : > { %v2467_v4 = vpop.eup %2466  ;;  %v702_v5 = vadd.f32 %v2019_v29, %v701_v3  ;;  %2313 = vmatprep.mubr.msk.f32.mxu1 %vm737_vm1, %v2465_v1  ;;  %v2861_v1 = vld [vmem:[%s3057_s6] ss:$0 sm:$0xff] }
  0xfc   : > { %2314 = vmatmul.mubr.msk.f32.gmra.mxu1 %vm737_vm1, %v2467_v4 }
  0xfd   : > { %2480 = vtanh.f32 %v702_v5 }
  0xfe   : > { %v2469_v6 = vpop.eup %2468  ;;  %2482 = vtanh.f32 %v707_v2 }
  0xff   : > { %v2471_v7 = vpop.eup %2470  ;;  %2316 = vmatprep.mubr.msk.f32.mxu1 %vm737_vm1, %v2469_v6 }
 0x100   : > { %2317 = vmatmul.mubr.msk.f32.gmra.mxu1 %vm737_vm1, %v2471_v7 }
 0x102   : > { %v2473_v8 = vpop.eup %2472 }
 0x103   : > { %v2475_v9 = vpop.eup %2474  ;;  %2319 = vmatprep.mubr.msk.f32.mxu1 %vm737_vm1, %v2473_v8 }
 0x104   : > { %2320 = vmatmul.mubr.msk.f32.gmra.mxu1 %vm737_vm1, %v2475_v9 }
 0x106   : > { %v2477_v10 = vpop.eup %2476 }
 0x107   : > { %v2479_v11 = vpop.eup %2478  ;;  %2322 = vmatprep.mubr.msk.f32.mxu1 %vm737_vm1, %v2477_v10 }
 0x108   : > { %2323 = vmatmul.mubr.msk.f32.gmra.mxu1 %vm737_vm1, %v2479_v11 }
 0x10a   : > { %v2481_v12 = vpop.eup %2480 }
 0x10b   : > { %v2483_v13 = vpop.eup %2482  ;;  %2325 = vmatprep.mubr.msk.f32.mxu1 %vm737_vm1, %v2481_v12 }
 0x10c   : > { %2326 = vmatmul.mubr.msk.f32.gmra.mxu1 %vm737_vm1, %v2483_v13 }
 0x1b0   : > { %v2306_v17 = vpop.f32.mrf.mxu1 }
 0x1b1   : > { %v858_v18 = vadd.f32 %v2306_v17, %v2036_v16 }
 0x1b2   : > { %v852_v19 = vpop.f32.mrf.mxu1 }
 0x1b3   : > { %v853_v20 = vadd.f32 %v2036_v16, %v852_v19 }
 0x1b4   : > { %v2309_v21 = vpop.f32.mrf.mxu1 }
 0x1b5   : > { %2484 = vtanh.f32 %v853_v20  ;;  %v868_v22 = vadd.f32 %v2309_v21, %v2036_v16 }
 0x1b6   : > { %2486 = vtanh.f32 %v858_v18  ;;  %v862_v23 = vpop.f32.mrf.mxu1 }
 0x1b7   : > { %v863_v24 = vadd.f32 %v2036_v16, %v862_v23 }
 0x1b8   : > { %v2312_v25 = vpop.f32.mrf.mxu1 }
 0x1b9   : > { %2488 = vtanh.f32 %v863_v24  ;;  %v878_v26 = vadd.f32 %v2312_v25, %v2036_v16 }
 0x1ba   : > { %2490 = vtanh.f32 %v868_v22  ;;  %v872_v27 = vpop.f32.mrf.mxu1 }
 0x1bb   : > { %v873_v28 = vadd.f32 %v2036_v16, %v872_v27 }
 0x1bc   : > { %v2315_v29 = vpop.f32.mrf.mxu1 }
 0x1bd   : > { %2492 = vtanh.f32 %v873_v28  ;;  %v888_v30 = vadd.f32 %v2315_v29, %v2036_v16 }
 0x1be   : > { %2494 = vtanh.f32 %v878_v26  ;;  %v882_v31 = vpop.f32.mrf.mxu1 }
 0x1bf   : > { %v883_v32 = vadd.f32 %v2036_v16, %v882_v31 }
 0x1c0   : > { %v2318_v33 = vpop.f32.mrf.mxu1 }
 0x1c1   : > { %2496 = vtanh.f32 %v883_v32  ;;  %v898_v35 = vadd.f32 %v2318_v33, %v2036_v16 }
 0x1c2   : > { %v2485_v34 = vpop.eup %2484  ;;  %2498 = vtanh.f32 %v888_v30  ;;  %v892_v36 = vpop.f32.mrf.mxu1 }
 0x1c3   : > { %v2487_v37 = vpop.eup %2486  ;;  %v893_v38 = vadd.f32 %v2036_v16, %v892_v36  ;;  %2332 = vmatprep.mubr.msk.f32.mxu1 %vm956_vm2, %v2485_v34  ;;  %v1369_v34 = vld [vmem:[%s3060_s9 + $0x8] sm:$0xff]  ;;  %v1589_v36 = vld [vmem:[%s3062_s11 + $0x18] sm:$0xff] }
 0x1c4   : > { %v2321_v39 = vpop.f32.mrf.mxu1  ;;  %2333 = vmatmul.mubr.msk.f32.vlgmr.msra.gmra.mxu1 %vm956_vm2, %v2487_v37  ;;  %v1588_v37 = vld [vmem:[%s3062_s11 + $0x10] sm:$0xff]  ;;  %2410 = vmatprep.subr.mxu0 %v1589_v36 }
 0x1c5   : > { %2500 = vtanh.f32 %v893_v38  ;;  %2443 = vmatpush3.msra.mxu1 %v1150_v15  ;;  %v908_v41 = vadd.f32 %v2321_v39, %v2036_v16  ;;  %v2070_v38 = vld [vmem:[%s3059_s8] ss:$0 sm:$0xff] }
 0x1c6   : > { %v2489_v40 = vpop.eup %2488  ;;  %2502 = vtanh.f32 %v898_v35  ;;  %v902_v42 = vpop.f32.mrf.mxu1  ;;  %2382 = vmatprep.subr.mxu1 %v1369_v34  ;;  %v1368_v35 = vld [vmem:[%s3060_s9] sm:$0xff] }
 0x1c7   : > { %v2491_v43 = vpop.eup %2490  ;;  %v903_v44 = vadd.f32 %v2036_v16, %v902_v42  ;;  %2335 = vmatprep.mubr.msk.f32.mxu1 %vm956_vm2, %v2489_v40 }
 0x1c8   : > { %v2324_v45 = vpop.f32.mrf.mxu1  ;;  %2336 = vmatmul.mubr.msk.f32.gmra.mxu1 %vm956_vm2, %v2491_v43 }
 0x1c9   : > { %2504 = vtanh.f32 %v903_v44  ;;  %v918_v47 = vadd.f32 %v2324_v45, %v2036_v16 }
 0x1ca   : > { %v2493_v46 = vpop.eup %2492  ;;  %2506 = vtanh.f32 %v908_v41  ;;  %v912_v48 = vpop.f32.mrf.mxu1 }
 0x1cb   : > { %v2495_v49 = vpop.eup %2494  ;;  %v913_v50 = vadd.f32 %v2036_v16, %v912_v48  ;;  %2338 = vmatprep.mubr.msk.f32.mxu1 %vm956_vm2, %v2493_v46 }
 0x1cc   : > { %v2327_v51 = vpop.f32.mrf.mxu1  ;;  %2339 = vmatmul.mubr.msk.f32.gmra.mxu1 %vm956_vm2, %v2495_v49 }
 0x1cd   : > { %2508 = vtanh.f32 %v913_v50  ;;  %v928_v53 = vadd.f32 %v2327_v51, %v2036_v16 }
 0x1ce   : > { %v2497_v52 = vpop.eup %2496  ;;  %2510 = vtanh.f32 %v918_v47  ;;  %v922_v54 = vpop.f32.mrf.mxu1 }
 0x1cf   : > { %v2499_v55 = vpop.eup %2498  ;;  %v923_v56 = vadd.f32 %v2036_v16, %v922_v54  ;;  %2341 = vmatprep.mubr.msk.f32.mxu1 %vm956_vm2, %v2497_v52 }
 0x1d0   : > { %2342 = vmatmul.mubr.msk.f32.gmra.mxu1 %vm956_vm2, %v2499_v55 }
 0x1d1   : > { %2512 = vtanh.f32 %v923_v56 }
 0x1d2   : > { %v2501_v57 = vpop.eup %2500  ;;  %2514 = vtanh.f32 %v928_v53 }
 0x1d3   : > { %v2503_v58 = vpop.eup %2502  ;;  %2344 = vmatprep.mubr.msk.f32.mxu1 %vm956_vm2, %v2501_v57 }
 0x1d4   : > { %2345 = vmatmul.mubr.msk.f32.gmra.mxu1 %vm956_vm2, %v2503_v58 }
 0x1d6   : > { %v2505_v59 = vpop.eup %2504 }
 0x1d7   : > { %v2507_v60 = vpop.eup %2506  ;;  %2347 = vmatprep.mubr.msk.f32.mxu1 %vm956_vm2, %v2505_v59 }
 0x1d8   : > { %2348 = vmatmul.mubr.msk.f32.gmra.mxu1 %vm956_vm2, %v2507_v60 }
 0x1da   : > { %v2509_v61 = vpop.eup %2508 }
 0x1db   : > { %v2511_v62 = vpop.eup %2510  ;;  %2350 = vmatprep.mubr.msk.f32.mxu1 %vm956_vm2, %v2509_v61 }
 0x1dc   : > { %2351 = vmatmul.mubr.msk.f32.gmra.mxu1 %vm956_vm2, %v2511_v62 }
 0x1de   : > { %v2513_v63 = vpop.eup %2512 }
 0x1df   : > { %v2515_v0 = vpop.eup %2514  ;;  %2353 = vmatprep.mubr.msk.f32.mxu1 %vm956_vm2, %v2513_v63 }
 0x1e0   : > { %2354 = vmatmul.mubr.msk.f32.gmra.mxu1 %vm956_vm2, %v2515_v0 }
 0x284   : > { %v2334_v2 = vpop.f32.mrf.mxu1 }
 0x285   : > { %v1077_v3 = vadd.f32 %v2334_v2, %v2861_v1 }
 0x286   : > { %v1071_v4 = vpop.f32.mrf.mxu1 }
 0x287   : > { %1887 = vst.msk [vmem:[%s2867_s15 + $0x8] sm:$0xff] %vm1158_vm3, %v1077_v3  ;;  %v1072_v5 = vadd.f32 %v2861_v1, %v1071_v4 }
 0x288   : > { %v2337_v6 = vpop.f32.mrf.mxu1 }
 0x289   : > { %1886 = vst.msk [vmem:[%s2867_s15] sm:$0xff] %vm1158_vm3, %v1072_v5  ;;  %v1087_v7 = vadd.f32 %v2337_v6, %v2861_v1  ;;  %2358 = vmatprep.mubr.msk.f32.mxu0 %vm1158_vm3, %v1072_v5 }
 0x28a   : > { %v1081_v8 = vpop.f32.mrf.mxu1  ;;  %2359 = vmatmul.mubr.msk.f32.vlgmr.msra.gmra.mxu0 %vm1158_vm3, %v1077_v3 }
 0x28b   : > { %1889 = vst.msk [vmem:[%s2867_s15 + $0x18] sm:$0xff] %vm1158_vm3, %v1087_v7  ;;  %v1082_v9 = vadd.f32 %v2861_v1, %v1081_v8  ;;  %2411 = vmatpush3.msra.mxu0 %v1589_v36 }
 0x28c   : > { %v2340_v10 = vpop.f32.mrf.mxu1  ;;  %2412 = vmatprep.subr.mxu0 %v1588_v37 }
 0x28d   : > { %1888 = vst.msk [vmem:[%s2867_s15 + $0x10] sm:$0xff] %vm1158_vm3, %v1082_v9  ;;  %v1097_v11 = vadd.f32 %v2340_v10, %v2861_v1  ;;  %2361 = vmatprep.mubr.msk.f32.mxu0 %vm1158_vm3, %v1082_v9  ;;  %2413 = vmatpush3.msra.mxu0 %v1588_v37 }
 0x28e   : > { %v1091_v12 = vpop.f32.mrf.mxu1  ;;  %2362 = vmatmul.mubr.msk.f32.gmra.mxu0 %vm1158_vm3, %v1087_v7 }
 0x28f   : > { %1891 = vst.msk [vmem:[%s2867_s15 + $0x28] sm:$0xff] %vm1158_vm3, %v1097_v11  ;;  %v1092_v13 = vadd.f32 %v2861_v1, %v1091_v12 }
 0x290   : > { %v2343_v14 = vpop.f32.mrf.mxu1 }
 0x291   : > { %1890 = vst.msk [vmem:[%s2867_s15 + $0x20] sm:$0xff] %vm1158_vm3, %v1092_v13  ;;  %v1107_v15 = vadd.f32 %v2343_v14, %v2861_v1  ;;  %2364 = vmatprep.mubr.msk.f32.mxu0 %vm1158_vm3, %v1092_v13 }
 0x292   : > { %v1101_v16 = vpop.f32.mrf.mxu1  ;;  %2365 = vmatmul.mubr.msk.f32.gmra.mxu0 %vm1158_vm3, %v1097_v11 }
 0x293   : > { %1893 = vst.msk [vmem:[%s2867_s15 + $0x38] sm:$0xff] %vm1158_vm3, %v1107_v15  ;;  %v1102_v17 = vadd.f32 %v2861_v1, %v1101_v16 }
 0x294   : > { %v2346_v18 = vpop.f32.mrf.mxu1 }
 0x295   : > { %1892 = vst.msk [vmem:[%s2867_s15 + $0x30] sm:$0xff] %vm1158_vm3, %v1102_v17  ;;  %v1117_v19 = vadd.f32 %v2346_v18, %v2861_v1  ;;  %2367 = vmatprep.mubr.msk.f32.mxu0 %vm1158_vm3, %v1102_v17 }
 0x296   : > { %v1111_v20 = vpop.f32.mrf.mxu1  ;;  %2368 = vmatmul.mubr.msk.f32.gmra.mxu0 %vm1158_vm3, %v1107_v15 }
 0x297   : > { %1895 = vst.msk [vmem:[%s2867_s15 + $0x48] sm:$0xff] %vm1158_vm3, %v1117_v19  ;;  %v1112_v21 = vadd.f32 %v2861_v1, %v1111_v20 }
 0x298   : > { %v2349_v22 = vpop.f32.mrf.mxu1 }
 0x299   : > { %1894 = vst.msk [vmem:[%s2867_s15 + $0x40] sm:$0xff] %vm1158_vm3, %v1112_v21  ;;  %v1127_v23 = vadd.f32 %v2349_v22, %v2861_v1  ;;  %2370 = vmatprep.mubr.msk.f32.mxu0 %vm1158_vm3, %v1112_v21 }
 0x29a   : > { %v1121_v24 = vpop.f32.mrf.mxu1  ;;  %2371 = vmatmul.mubr.msk.f32.gmra.mxu0 %vm1158_vm3, %v1117_v19 }
 0x29b   : > { %1897 = vst.msk [vmem:[%s2867_s15 + $0x58] sm:$0xff] %vm1158_vm3, %v1127_v23  ;;  %v1122_v25 = vadd.f32 %v2861_v1, %v1121_v24  ;;  %v1586_v24 = vld [vmem:[%s3062_s11] sm:$0xff] }
 0x29c   : > { %v2352_v26 = vpop.f32.mrf.mxu1 }
 0x29d   : > { %1896 = vst.msk [vmem:[%s2867_s15 + $0x50] sm:$0xff] %vm1158_vm3, %v1122_v25  ;;  %v1137_v27 = vadd.f32 %v2352_v26, %v2861_v1  ;;  %2373 = vmatprep.mubr.msk.f32.mxu0 %vm1158_vm3, %v1122_v25  ;;  %v2087_v25 = vld [vmem:[%s3061_s10] ss:$0 sm:$0xff] }
 0x29e   : > { %v1131_v28 = vpop.f32.mrf.mxu1  ;;  %2374 = vmatmul.mubr.msk.f32.gmra.mxu0 %vm1158_vm3, %v1127_v23  ;;  %v1587_v23 = vld [vmem:[%s3062_s11 + $0x8] sm:$0xff] }
 0x29f   : > { %1899 = vst.msk [vmem:[%s2867_s15 + $0x68] sm:$0xff] %vm1158_vm3, %v1137_v27  ;;  %v1132_v29 = vadd.f32 %v2861_v1, %v1131_v28  ;;  %2414 = vmatprep.subr.mxu0 %v1587_v23 }
 0x2a0   : > { %v2355_v30 = vpop.f32.mrf.mxu1  ;;  %2415 = vmatpush3.msra.mxu0 %v1587_v23 }
 0x2a1   : > { %1898 = vst.msk [vmem:[%s2867_s15 + $0x60] sm:$0xff] %vm1158_vm3, %v1132_v29  ;;  %v1147_v31 = vadd.f32 %v2355_v30, %v2861_v1  ;;  %2376 = vmatprep.mubr.msk.f32.mxu0 %vm1158_vm3, %v1132_v29  ;;  %2416 = vmatprep.subr.mxu0 %v1586_v24 }
 0x2a2   : > { %v1141_v32 = vpop.f32.mrf.mxu1  ;;  %2377 = vmatmul.mubr.msk.f32.gmra.mxu0 %vm1158_vm3, %v1137_v27 }
 0x2a3   : > { %1901 = vst.msk [vmem:[%s2867_s15 + $0x78] sm:$0xff] %vm1158_vm3, %v1147_v31  ;;  %v1142_v33 = vadd.f32 %v2861_v1, %v1141_v32  ;;  %2417 = vmatpush3.msra.mxu0 %v1586_v24 }
 0x2a5   : > { %1900 = vst.msk [vmem:[%s2867_s15 + $0x70] sm:$0xff] %vm1158_vm3, %v1142_v33  ;;  %2379 = vmatprep.mubr.msk.f32.mxu1 %vm1158_vm3, %v1142_v33 }
 0x2a6   : > { %2380 = vmatmul.mubr.msk.f32.vlgmr.msra.gmra.mxu1 %vm1158_vm3, %v1147_v31 }
 0x2a7   : > { %2383 = vmatpush3.msra.mxu1 %v1369_v34 }
 0x2a8   : > { %2384 = vmatprep.subr.mxu1 %v1368_v35 }
 0x2a9   : > { %2385 = vmatpush3.msra.mxu1 %v1368_v35 }
 0x34a   : > { %v2360_v39 = vpop.f32.mrf.mxu0 }
 0x34b   : > { %v1279_v40 = vadd.f32 %v2360_v39, %v2070_v38 }
 0x34c   : > { %v1273_v41 = vpop.f32.mrf.mxu0 }
 0x34d   : > { %v1274_v42 = vadd.f32 %v2070_v38, %v1273_v41 }
 0x34e   : > { %v2363_v43 = vpop.f32.mrf.mxu0 }
 0x34f   : > { %2516 = vtanh.f32 %v1274_v42  ;;  %v1289_v44 = vadd.f32 %v2363_v43, %v2070_v38 }
 0x350   : > { %2518 = vtanh.f32 %v1279_v40  ;;  %v1283_v45 = vpop.f32.mrf.mxu0 }
 0x351   : > { %v1284_v46 = vadd.f32 %v2070_v38, %v1283_v45 }
 0x352   : > { %v2366_v47 = vpop.f32.mrf.mxu0 }
 0x353   : > { %2520 = vtanh.f32 %v1284_v46  ;;  %v1299_v48 = vadd.f32 %v2366_v47, %v2070_v38 }
 0x354   : > { %2522 = vtanh.f32 %v1289_v44  ;;  %v1293_v49 = vpop.f32.mrf.mxu0 }
 0x355   : > { %v1294_v50 = vadd.f32 %v2070_v38, %v1293_v49 }
 0x356   : > { %v2369_v51 = vpop.f32.mrf.mxu0 }
 0x357   : > { %2524 = vtanh.f32 %v1294_v50  ;;  %v1309_v52 = vadd.f32 %v2369_v51, %v2070_v38 }
 0x358   : > { %2526 = vtanh.f32 %v1299_v48  ;;  %v1303_v53 = vpop.f32.mrf.mxu0 }
 0x359   : > { %v1304_v54 = vadd.f32 %v2070_v38, %v1303_v53 }
 0x35a   : > { %v2372_v55 = vpop.f32.mrf.mxu0 }
 0x35b   : > { %2528 = vtanh.f32 %v1304_v54  ;;  %v1319_v57 = vadd.f32 %v2372_v55, %v2070_v38 }
 0x35c   : > { %v2517_v56 = vpop.eup %2516  ;;  %2530 = vtanh.f32 %v1309_v52  ;;  %v1313_v58 = vpop.f32.mrf.mxu0 }
 0x35d   : > { %v2519_v59 = vpop.eup %2518  ;;  %v1314_v60 = vadd.f32 %v2070_v38, %v1313_v58  ;;  %2386 = vmatprep.mubr.msk.f32.mxu1 %vm956_vm2, %v2517_v56 }
 0x35e   : > { %v2375_v61 = vpop.f32.mrf.mxu0  ;;  %2387 = vmatmul.mubr.msk.f32.vlgmr.msra.gmra.mxu1 %vm956_vm2, %v2519_v59 }
 0x35f   : > { %2532 = vtanh.f32 %v1314_v60  ;;  %v1329_v63 = vadd.f32 %v2375_v61, %v2070_v38 }
 0x360   : > { %v2521_v62 = vpop.eup %2520  ;;  %2534 = vtanh.f32 %v1319_v57  ;;  %v1323_v0 = vpop.f32.mrf.mxu0 }
 0x361   : > { %v2523_v1 = vpop.eup %2522  ;;  %v1324_v2 = vadd.f32 %v2070_v38, %v1323_v0  ;;  %2389 = vmatprep.mubr.msk.f32.mxu1 %vm956_vm2, %v2521_v62 }
 0x362   : > { %v2378_v3 = vpop.f32.mrf.mxu0  ;;  %2390 = vmatmul.mubr.msk.f32.gmra.mxu1 %vm956_vm2, %v2523_v1 }
 0x363   : > { %2536 = vtanh.f32 %v1324_v2  ;;  %v1339_v5 = vadd.f32 %v2378_v3, %v2070_v38 }
 0x364   : > { %v2525_v4 = vpop.eup %2524  ;;  %2538 = vtanh.f32 %v1329_v63  ;;  %v1333_v6 = vpop.f32.mrf.mxu0 }
 0x365   : > { %v2527_v7 = vpop.eup %2526  ;;  %v1334_v8 = vadd.f32 %v2070_v38, %v1333_v6  ;;  %2392 = vmatprep.mubr.msk.f32.mxu1 %vm956_vm2, %v2525_v4 }
 0x366   : > { %v2381_v9 = vpop.f32.mrf.mxu1  ;;  %2393 = vmatmul.mubr.msk.f32.gmra.mxu1 %vm956_vm2, %v2527_v7 }
 0x367   : > { %2540 = vtanh.f32 %v1334_v8  ;;  %v1349_v11 = vadd.f32 %v2381_v9, %v2070_v38 }
 0x368   : > { %v2529_v10 = vpop.eup %2528  ;;  %2542 = vtanh.f32 %v1339_v5  ;;  %v1343_v12 = vpop.f32.mrf.mxu1 }
 0x369   : > { %v2531_v13 = vpop.eup %2530  ;;  %v1344_v14 = vadd.f32 %v2070_v38, %v1343_v12  ;;  %2395 = vmatprep.mubr.msk.f32.mxu1 %vm956_vm2, %v2529_v10  ;;  %v2992_v10 = vld [vmem:[%s3063_s12] ss:$0 sm:$0xff] }
 0x36a   : > { %2396 = vmatmul.mubr.msk.f32.gmra.mxu1 %vm956_vm2, %v2531_v13 }
 0x36b   : > { %2544 = vtanh.f32 %v1344_v14 }
 0x36c   : > { %v2533_v15 = vpop.eup %2532  ;;  %2546 = vtanh.f32 %v1349_v11 }
 0x36d   : > { %v2535_v16 = vpop.eup %2534  ;;  %2398 = vmatprep.mubr.msk.f32.mxu1 %vm956_vm2, %v2533_v15 }
 0x36e   : > { %2399 = vmatmul.mubr.msk.f32.gmra.mxu1 %vm956_vm2, %v2535_v16 }
 0x370   : > { %v2537_v17 = vpop.eup %2536 }
 0x371   : > { %v2539_v18 = vpop.eup %2538  ;;  %2401 = vmatprep.mubr.msk.f32.mxu1 %vm956_vm2, %v2537_v17 }
 0x372   : > { %2402 = vmatmul.mubr.msk.f32.gmra.mxu1 %vm956_vm2, %v2539_v18 }
 0x374   : > { %v2541_v19 = vpop.eup %2540 }
 0x375   : > { %v2543_v20 = vpop.eup %2542  ;;  %2404 = vmatprep.mubr.msk.f32.mxu1 %vm956_vm2, %v2541_v19 }
 0x376   : > { %2405 = vmatmul.mubr.msk.f32.gmra.mxu1 %vm956_vm2, %v2543_v20 }
 0x378   : > { %v2545_v21 = vpop.eup %2544 }
 0x379   : > { %v2547_v22 = vpop.eup %2546  ;;  %2407 = vmatprep.mubr.msk.f32.mxu1 %vm956_vm2, %v2545_v21 }
 0x37a   : > { %2408 = vmatmul.mubr.msk.f32.gmra.mxu1 %vm956_vm2, %v2547_v22 }
 0x41e   : > { %v2388_v26 = vpop.f32.mrf.mxu1 }
 0x41f   : > { %v1497_v27 = vadd.f32 %v2388_v26, %v2087_v25 }
 0x420   : > { %v1491_v28 = vpop.f32.mrf.mxu1 }
 0x421   : > { %v1492_v29 = vadd.f32 %v2087_v25, %v1491_v28 }
 0x422   : > { %v2391_v30 = vpop.f32.mrf.mxu1 }
 0x423   : > { %2548 = vtanh.f32 %v1492_v29  ;;  %v1507_v31 = vadd.f32 %v2391_v30, %v2087_v25 }
 0x424   : > { %2550 = vtanh.f32 %v1497_v27  ;;  %v1501_v32 = vpop.f32.mrf.mxu1 }
 0x425   : > { %v1502_v33 = vadd.f32 %v2087_v25, %v1501_v32 }
 0x426   : > { %v2394_v34 = vpop.f32.mrf.mxu1 }
 0x427   : > { %2552 = vtanh.f32 %v1502_v33  ;;  %v1517_v35 = vadd.f32 %v2394_v34, %v2087_v25 }
 0x428   : > { %2554 = vtanh.f32 %v1507_v31  ;;  %v1511_v36 = vpop.f32.mrf.mxu1 }
 0x429   : > { %v1512_v37 = vadd.f32 %v2087_v25, %v1511_v36 }
 0x42a   : > { %v2397_v38 = vpop.f32.mrf.mxu1 }
 0x42b   : > { %2556 = vtanh.f32 %v1512_v37  ;;  %v1527_v39 = vadd.f32 %v2397_v38, %v2087_v25 }
 0x42c   : > { %2558 = vtanh.f32 %v1517_v35  ;;  %v1521_v40 = vpop.f32.mrf.mxu1 }
 0x42d   : > { %v1522_v41 = vadd.f32 %v2087_v25, %v1521_v40 }
 0x42e   : > { %v2400_v42 = vpop.f32.mrf.mxu1 }
 0x42f   : > { %2560 = vtanh.f32 %v1522_v41  ;;  %v1537_v44 = vadd.f32 %v2400_v42, %v2087_v25 }
 0x430   : > { %v2549_v43 = vpop.eup %2548  ;;  %2562 = vtanh.f32 %v1527_v39  ;;  %v1531_v45 = vpop.f32.mrf.mxu1 }
 0x431   : > { %v2551_v46 = vpop.eup %2550  ;;  %v1532_v47 = vadd.f32 %v2087_v25, %v1531_v45  ;;  %2418 = vmatprep.mubr.msk.f32.mxu0 %vm737_vm1, %v2549_v43 }
 0x432   : > { %v2403_v48 = vpop.f32.mrf.mxu1  ;;  %2419 = vmatmul.mubr.msk.f32.vlgmr.msra.gmra.mxu0 %vm737_vm1, %v2551_v46 }
 0x433   : > { %2564 = vtanh.f32 %v1532_v47  ;;  %v1547_v50 = vadd.f32 %v2403_v48, %v2087_v25 }
 0x434   : > { %v2553_v49 = vpop.eup %2552  ;;  %2566 = vtanh.f32 %v1537_v44  ;;  %v1541_v51 = vpop.f32.mrf.mxu1 }
 0x435   : > { %v2555_v52 = vpop.eup %2554  ;;  %v1542_v53 = vadd.f32 %v2087_v25, %v1541_v51  ;;  %2421 = vmatprep.mubr.msk.f32.mxu0 %vm737_vm1, %v2553_v49 }
 0x436   : > { %v2406_v54 = vpop.f32.mrf.mxu1  ;;  %2422 = vmatmul.mubr.msk.f32.gmra.mxu0 %vm737_vm1, %v2555_v52 }
 0x437   : > { %2568 = vtanh.f32 %v1542_v53  ;;  %v1557_v56 = vadd.f32 %v2406_v54, %v2087_v25 }
 0x438   : > { %v2557_v55 = vpop.eup %2556  ;;  %2570 = vtanh.f32 %v1547_v50  ;;  %v1551_v57 = vpop.f32.mrf.mxu1 }
 0x439   : > { %v2559_v58 = vpop.eup %2558  ;;  %v1552_v59 = vadd.f32 %v2087_v25, %v1551_v57  ;;  %2424 = vmatprep.mubr.msk.f32.mxu0 %vm737_vm1, %v2557_v55 }
 0x43a   : > { %v2409_v60 = vpop.f32.mrf.mxu1  ;;  %2425 = vmatmul.mubr.msk.f32.gmra.mxu0 %vm737_vm1, %v2559_v58 }
 0x43b   : > { %2572 = vtanh.f32 %v1552_v59  ;;  %v1567_v62 = vadd.f32 %v2409_v60, %v2087_v25 }
 0x43c   : > { %v2561_v61 = vpop.eup %2560  ;;  %2574 = vtanh.f32 %v1557_v56  ;;  %v1561_v63 = vpop.f32.mrf.mxu1 }
 0x43d   : > { %v2563_v0 = vpop.eup %2562  ;;  %v1562_v1 = vadd.f32 %v2087_v25, %v1561_v63  ;;  %2427 = vmatprep.mubr.msk.f32.mxu0 %vm737_vm1, %v2561_v61 }
 0x43e   : > { %2428 = vmatmul.mubr.msk.f32.gmra.mxu0 %vm737_vm1, %v2563_v0 }
 0x43f   : > { %2576 = vtanh.f32 %v1562_v1 }
 0x440   : > { %v2565_v2 = vpop.eup %2564  ;;  %2578 = vtanh.f32 %v1567_v62 }
 0x441   : > { %v2567_v3 = vpop.eup %2566  ;;  %2430 = vmatprep.mubr.msk.f32.mxu0 %vm737_vm1, %v2565_v2 }
 0x442   : > { %2431 = vmatmul.mubr.msk.f32.gmra.mxu0 %vm737_vm1, %v2567_v3 }
 0x444   : > { %v2569_v4 = vpop.eup %2568 }
 0x445   : > { %v2571_v5 = vpop.eup %2570  ;;  %2433 = vmatprep.mubr.msk.f32.mxu0 %vm737_vm1, %v2569_v4 }
 0x446   : > { %2434 = vmatmul.mubr.msk.f32.gmra.mxu0 %vm737_vm1, %v2571_v5 }
 0x448   : > { %v2573_v6 = vpop.eup %2572 }
 0x449   : > { %v2575_v7 = vpop.eup %2574  ;;  %2436 = vmatprep.mubr.msk.f32.mxu0 %vm737_vm1, %v2573_v6 }
 0x44a   : > { %2437 = vmatmul.mubr.msk.f32.gmra.mxu0 %vm737_vm1, %v2575_v7 }
 0x44c   : > { %v2577_v8 = vpop.eup %2576 }
 0x44d   : > { %v2579_v9 = vpop.eup %2578  ;;  %2439 = vmatprep.mubr.msk.f32.mxu0 %vm737_vm1, %v2577_v8 }
 0x44e   : > { %2440 = vmatmul.mubr.msk.f32.gmra.mxu0 %vm737_vm1, %v2579_v9 }
 0x4f2   : > { %v2420_v11 = vpop.f32.mrf.mxu0 }
 0x4f3   : > { %v1717_v12 = vadd.f32 %v2420_v11, %v2992_v10 }
 0x4f4   : > { %v1711_v13 = vpop.f32.mrf.mxu0 }
 0x4f5   : > { %v2122_v14 = vmul.f32 -1.442695, %v1717_v12  ;;  %v1712_v15 = vadd.f32 %v2992_v10, %v1711_v13 }
 0x4f6   : > { %v2423_v16 = vpop.f32.mrf.mxu0 }
 0x4f7   : > { %2580 = vpow2.f32 %v2122_v14  ;;  %v2121_v17 = vmul.f32 -1.442695, %v1712_v15  ;;  %v1727_v18 = vadd.f32 %v2423_v16, %v2992_v10 }
 0x4f8   : > { %v1721_v19 = vpop.f32.mrf.mxu0 }
 0x4f9   : > { %2582 = vpow2.f32 %v2121_v17  ;;  %v2124_v20 = vmul.f32 -1.442695, %v1727_v18  ;;  %v1722_v21 = vadd.f32 %v2992_v10, %v1721_v19 }
 0x4fa   : > { %v2426_v22 = vpop.f32.mrf.mxu0 }
 0x4fb   : > { %2584 = vpow2.f32 %v2124_v20  ;;  %v2123_v23 = vmul.f32 -1.442695, %v1722_v21  ;;  %v1737_v24 = vadd.f32 %v2426_v22, %v2992_v10 }
 0x4fc   : > { %v1731_v25 = vpop.f32.mrf.mxu0 }
 0x4fd   : > { %2586 = vpow2.f32 %v2123_v23  ;;  %v2126_v26 = vmul.f32 -1.442695, %v1737_v24  ;;  %v1732_v27 = vadd.f32 %v2992_v10, %v1731_v25 }
 0x4fe   : > { %v2429_v28 = vpop.f32.mrf.mxu0 }
 0x4ff   : > { %2588 = vpow2.f32 %v2126_v26  ;;  %v2125_v29 = vmul.f32 -1.442695, %v1732_v27  ;;  %v1747_v30 = vadd.f32 %v2429_v28, %v2992_v10 }
 0x500   : > { %v1741_v31 = vpop.f32.mrf.mxu0 }
 0x501   : > { %2590 = vpow2.f32 %v2125_v29  ;;  %v2128_v32 = vmul.f32 -1.442695, %v1747_v30  ;;  %v1742_v33 = vadd.f32 %v2992_v10, %v1741_v31 }
 0x502   : > { %v2432_v34 = vpop.f32.mrf.mxu0 }
 0x503   : > { %2592 = vpow2.f32 %v2128_v32  ;;  %v2127_v35 = vmul.f32 -1.442695, %v1742_v33  ;;  %v1757_v36 = vadd.f32 %v2432_v34, %v2992_v10 }
 0x504   : > { %v2581_v37 = vpop.eup %2580  ;;  %v1751_v38 = vpop.f32.mrf.mxu0 }
 0x505   : > { %v1839_v39 = vadd.f32 1.0, %v2581_v37  ;;  %2594 = vpow2.f32 %v2127_v35  ;;  %v2130_v40 = vmul.f32 -1.442695, %v1757_v36  ;;  %v1752_v41 = vadd.f32 %v2992_v10, %v1751_v38 }
 0x506   : > { %v2583_v42 = vpop.eup %2582  ;;  %v2435_v43 = vpop.f32.mrf.mxu0 }
 0x507   : > { %2596 = vrcp.f32 %v1839_v39  ;;  %v1838_v44 = vadd.f32 1.0, %v2583_v42  ;;  %v2129_v45 = vmul.f32 -1.442695, %v1752_v41  ;;  %v1767_v46 = vadd.f32 %v2435_v43, %v2992_v10 }
 0x508   : > { %v2585_v47 = vpop.eup %2584  ;;  %2598 = vpow2.f32 %v2130_v40  ;;  %v1761_v48 = vpop.f32.mrf.mxu0 }
 0x509   : > { %2600 = vrcp.f32 %v1838_v44  ;;  %v1841_v49 = vadd.f32 1.0, %v2585_v47  ;;  %v2132_v50 = vmul.f32 -1.442695, %v1767_v46  ;;  %v1762_v51 = vadd.f32 %v2992_v10, %v1761_v48 }
 0x50a   : > { %v2587_v52 = vpop.eup %2586  ;;  %2602 = vpow2.f32 %v2129_v45  ;;  %v2438_v53 = vpop.f32.mrf.mxu0 }
 0x50b   : > { %2604 = vrcp.f32 %v1841_v49  ;;  %v1840_v54 = vadd.f32 1.0, %v2587_v52  ;;  %v2131_v55 = vmul.f32 -1.442695, %v1762_v51  ;;  %v1777_v56 = vadd.f32 %v2438_v53, %v2992_v10 }
 0x50c   : > { %v2589_v57 = vpop.eup %2588  ;;  %2606 = vpow2.f32 %v2132_v50  ;;  %v1771_v58 = vpop.f32.mrf.mxu0 }
 0x50d   : > { %2608 = vrcp.f32 %v1840_v54  ;;  %v1843_v59 = vadd.f32 1.0, %v2589_v57  ;;  %v2134_v60 = vmul.f32 -1.442695, %v1777_v56  ;;  %v1772_v61 = vadd.f32 %v2992_v10, %v1771_v58 }
 0x50e   : > { %v2591_v62 = vpop.eup %2590  ;;  %2610 = vpow2.f32 %v2131_v55  ;;  %v2441_v63 = vpop.f32.mrf.mxu0 }
 0x50f   : > { %2612 = vrcp.f32 %v1843_v59  ;;  %v1842_v0 = vadd.f32 1.0, %v2591_v62  ;;  %v2133_v1 = vmul.f32 -1.442695, %v1772_v61  ;;  %v1787_v2 = vadd.f32 %v2441_v63, %v2992_v10 }
 0x510   : > { %v2593_v3 = vpop.eup %2592  ;;  %2614 = vpow2.f32 %v2134_v60  ;;  %v1781_v4 = vpop.f32.mrf.mxu0 }
 0x511   : > { %2616 = vrcp.f32 %v1842_v0  ;;  %v1845_v5 = vadd.f32 1.0, %v2593_v3  ;;  %v2136_v6 = vmul.f32 -1.442695, %v1787_v2  ;;  %v1782_v7 = vadd.f32 %v2992_v10, %v1781_v4 }
 0x512   : > { %v2595_v8 = vpop.eup %2594  ;;  %2618 = vpow2.f32 %v2133_v1 }
 0x513   : > { %2620 = vrcp.f32 %v1845_v5  ;;  %v1844_v9 = vadd.f32 1.0, %v2595_v8  ;;  %v2135_v11 = vmul.f32 -1.442695, %v1782_v7 }
 0x514   : > { %v2597_v12 = vpop.eup %2596  ;;  %2622 = vpow2.f32 %v2136_v6 }
 0x515   : > { %v2599_v13 = vpop.eup %2598  ;;  %1903 = vst.msk [vmem:[%s3014_s22 + $0x8] sm:$0xff] %vm516_vm0, %v2597_v12  ;;  %2624 = vrcp.f32 %v1844_v9 }
 0x516   : > { %v2601_v10 = vpop.eup %2600  ;;  %v1847_v14 = vadd.f32 1.0, %v2599_v13  ;;  %2626 = vpow2.f32 %v2135_v11 }
 0x517   : > { %v2603_v15 = vpop.eup %2602  ;;  %1902 = vst.msk [vmem:[%s3014_s22] sm:$0xff] %vm516_vm0, %v2601_v10 }
 0x518   : > { %v2605_v16 = vpop.eup %2604  ;;  %2628 = vrcp.f32 %v1847_v14  ;;  %v1846_v17 = vadd.f32 1.0, %v2603_v15 }
 0x519   : > { %v2607_v18 = vpop.eup %2606  ;;  %1905 = vst.msk [vmem:[%s3014_s22 + $0x18] sm:$0xff] %vm516_vm0, %v2605_v16 }
 0x51a   : > { %v2609_v19 = vpop.eup %2608  ;;  %2630 = vrcp.f32 %v1846_v17  ;;  %v1849_v20 = vadd.f32 1.0, %v2607_v18 }
 0x51b   : > { %v2611_v21 = vpop.eup %2610  ;;  %1904 = vst.msk [vmem:[%s3014_s22 + $0x10] sm:$0xff] %vm516_vm0, %v2609_v19 }
 0x51c   : > { %v2613_v22 = vpop.eup %2612  ;;  %2632 = vrcp.f32 %v1849_v20  ;;  %v1848_v23 = vadd.f32 1.0, %v2611_v21 }
 0x51d   : > { %v2615_v24 = vpop.eup %2614  ;;  %1907 = vst.msk [vmem:[%s3014_s22 + $0x28] sm:$0xff] %vm516_vm0, %v2613_v22 }
 0x51e   : > { %v2617_v25 = vpop.eup %2616  ;;  %2634 = vrcp.f32 %v1848_v23  ;;  %v1851_v26 = vadd.f32 1.0, %v2615_v24 }
 0x51f   : > { %v2619_v27 = vpop.eup %2618  ;;  %1906 = vst.msk [vmem:[%s3014_s22 + $0x20] sm:$0xff] %vm516_vm0, %v2617_v25 }
 0x520   : > { %v2621_v28 = vpop.eup %2620  ;;  %2636 = vrcp.f32 %v1851_v26  ;;  %v1850_v29 = vadd.f32 1.0, %v2619_v27 }
 0x521   : > { %v2623_v30 = vpop.eup %2622  ;;  %1909 = vst.msk [vmem:[%s3014_s22 + $0x38] sm:$0xff] %vm516_vm0, %v2621_v28 }
 0x522   : > { %v2625_v31 = vpop.eup %2624  ;;  %2638 = vrcp.f32 %v1850_v29  ;;  %v1853_v32 = vadd.f32 1.0, %v2623_v30 }
 0x523   : > { %v2627_v33 = vpop.eup %2626  ;;  %1908 = vst.msk [vmem:[%s3014_s22 + $0x30] sm:$0xff] %vm516_vm0, %v2625_v31 }
 0x524   : > { %2640 = vrcp.f32 %v1853_v32  ;;  %v1852_v34 = vadd.f32 1.0, %v2627_v33 }
 0x525   : > { %v2629_v35 = vpop.eup %2628 }
 0x526   : > { %1911 = vst.msk [vmem:[%s3014_s22 + $0x48] sm:$0xff] %vm516_vm0, %v2629_v35  ;;  %2642 = vrcp.f32 %v1852_v34 }
 0x527   : > { %v2631_v36 = vpop.eup %2630 }
 0x528   : > { %1910 = vst.msk [vmem:[%s3014_s22 + $0x40] sm:$0xff] %vm516_vm0, %v2631_v36 }
 0x529   : > { %v2633_v37 = vpop.eup %2632 }
 0x52a   : > { %1913 = vst.msk [vmem:[%s3014_s22 + $0x58] sm:$0xff] %vm516_vm0, %v2633_v37 }
 0x52b   : > { %v2635_v38 = vpop.eup %2634 }
 0x52c   : > { %1912 = vst.msk [vmem:[%s3014_s22 + $0x50] sm:$0xff] %vm516_vm0, %v2635_v38 }
 0x52d   : > { %v2637_v39 = vpop.eup %2636 }
 0x52e   : > { %1915 = vst.msk [vmem:[%s3014_s22 + $0x68] sm:$0xff] %vm516_vm0, %v2637_v39 }
 0x52f   : > { %v2639_v40 = vpop.eup %2638 }
 0x530   : > { %1914 = vst.msk [vmem:[%s3014_s22 + $0x60] sm:$0xff] %vm516_vm0, %v2639_v40 }
 0x531   : > { %v2641_v41 = vpop.eup %2640 }
 0x532   : > { %1917 = vst.msk [vmem:[%s3014_s22 + $0x78] sm:$0xff] %vm516_vm0, %v2641_v41 }
 0x533   : > { %v2643_v42 = vpop.eup %2642 }
 0x534   : > { %1916 = vst.msk [vmem:[%s3014_s22 + $0x70] sm:$0xff] %vm516_vm0, %v2643_v42 }
 0x535 PF: > { %s25_s29 = sadd.s32 1, %s2650_s29  }
 0x536   : > { %p22_p4 = scmp.ge.s32.totalorder %s25_s29, 4  }
 0x538   :  { %24 = sbr.rel (!%p22_p4) target bundleno = 1 (0x1), region = 114 }

</bundles_post_ra>
